<compile_context>
chip_gen: v7x
topology: tpu7x:2x2x1
jax: 0.10.0
libtpu: 0.0.40
codegen_flags: <defaults>
</compile_context>

<pallas_src>
import math
import jax
import jax.numpy as jnp
from jax.experimental import pallas as pl
from jax.experimental.pallas import tpu as pltpu

INPUT_DIM = 768
TIME_ENC_DIM = 768
HALF_ENC = TIME_ENC_DIM // 2           # 384
CONCAT_DIM = INPUT_DIM + TIME_ENC_DIM  # 1536
LAYER_DIMS = [CONCAT_DIM, 1024, 128, 64, 16, 1]
NOUT = 128  # lane-dense padded output width; real result lives in column 0


def _sin_mlp_kernel(t_ref, embed_ref, freq_ref,
                    w_emb_ref, w_sin_ref, w_cos_ref, b_ref, out_ref):
    # Sinusoidal encoding. The 1/1000 timestep scale is pre-folded into freq.
    args = t_ref[...] * freq_ref[...]                     # (TM, 384)
    s = jnp.sin(args)
    c = jnp.cos(args)
    # Folded linear MLP; the concat is removed by splitting the contraction.
    h = jnp.dot(embed_ref[...], w_emb_ref[...], preferred_element_type=jnp.float32)
    h = h + jnp.dot(s, w_sin_ref[...], preferred_element_type=jnp.float32)
    h = h + jnp.dot(c, w_cos_ref[...], preferred_element_type=jnp.float32)
    out_ref[...] = (h + b_ref[...]).astype(out_ref.dtype)


def _fold_linear_chain(params):
    """Fold W1..W5 / b1..b5 into a single (1536, 1) weight and (1, 1) bias.

    Exact for this nonlinearity-free MLP (Dropout is identity in eval mode);
    only reassociates f32 arithmetic. Weight fold is done right-to-left so
    every intermediate product has a single output column (cheap).
    """
    ws = params[0::2]
    bs = params[1::2]
    w_c = ws[-1]                               # (16, 1)
    for w in reversed(ws[:-1]):
        w_c = w @ w_c                          # ... -> (1536, 1)
    b_c = bs[0]
    for w, b in zip(ws[1:], bs[1:]):
        b_c = b_c @ w + b                      # (1, 1)
    return w_c, b_c


def _row_tile(B):
    """Pick a batch tile (multiple of 8, <=512) and padded row count."""
    if B <= 128:
        tm = max(8, -(-B // 8) * 8)
    elif B <= 512:
        tm = 128
    elif B <= 1024:
        tm = 256
    else:
        tm = 512
    rows = -(-B // tm) * tm
    return tm, rows


def sinusoidal_time_mlp(embed, timesteps, params):
    """embed: (B, 768) f32, timesteps: (B,) f32/int, params: list of 10 arrays."""
    B = embed.shape[0]

    # --- fold the whole linear chain to a single matvec + bias ---
    w_c, b_c = _fold_linear_chain(params)
    w_pad = jnp.zeros((CONCAT_DIM, NOUT), jnp.float32).at[:, :1].set(w_c)
    bias_pad = jnp.zeros((1, NOUT), jnp.float32).at[:, :1].set(b_c)
    w_emb = w_pad[:INPUT_DIM]                          # (768, 128)
    w_sin = w_pad[INPUT_DIM:INPUT_DIM + HALF_ENC]      # (384, 128)
    w_cos = w_pad[INPUT_DIM + HALF_ENC:]               # (384, 128)

    # frequencies with the /1000 timestep scaling folded in
    freqs = (jnp.exp(jnp.arange(0, TIME_ENC_DIM, 2, dtype=jnp.float32)
                     * -(math.log(10000.0) / TIME_ENC_DIM)) / 1000.0
             ).reshape(1, HALF_ENC)

    # --- batch tiling: pad rows to a multiple of the tile ---
    tm, rows = _row_tile(B)

    t = timesteps.astype(jnp.float32).reshape(B, 1)
    t = jnp.pad(t, ((0, rows - B), (0, 0)))
    x = jnp.pad(embed.astype(jnp.float32), ((0, rows - B), (0, 0)))

    out = pl.pallas_call(
        _sin_mlp_kernel,
        out_shape=jax.ShapeDtypeStruct((rows, NOUT), jnp.float32),
        grid=(rows // tm,),
        in_specs=[
            pl.BlockSpec((tm, 1), lambda i: (i, 0)),            # timesteps
            pl.BlockSpec((tm, INPUT_DIM), lambda i: (i, 0)),    # embed
            pl.BlockSpec((1, HALF_ENC), lambda i: (0, 0)),      # freqs (resident)
            pl.BlockSpec((INPUT_DIM, NOUT), lambda i: (0, 0)),  # folded W (embed part)
            pl.BlockSpec((HALF_ENC, NOUT), lambda i: (0, 0)),   # folded W (sin part)
            pl.BlockSpec((HALF_ENC, NOUT), lambda i: (0, 0)),   # folded W (cos part)
            pl.BlockSpec((1, NOUT), lambda i: (0, 0)),          # folded bias
        ],
        out_specs=pl.BlockSpec((tm, NOUT), lambda i: (i, 0)),
        compiler_params=pltpu.CompilerParams(
            dimension_semantics=("parallel",),
            vmem_limit_bytes=32 << 20),
    )(t, x, freqs, w_emb, w_sin, w_cos, bias_pad)
    return out[:B, :1]


def init_params(key):
    """Deterministic PyTorch-Linear-style init: U(-1/sqrt(fan_in), +1/sqrt(fan_in))."""
    params = []
    for i in range(len(LAYER_DIMS) - 1):
        fan_in, fan_out = LAYER_DIMS[i], LAYER_DIMS[i + 1]
        key, kw, kb = jax.random.split(key, 3)
        bound = 1.0 / math.sqrt(fan_in)
        w = jax.random.uniform(kw, (fan_in, fan_out), jnp.float32, -bound, bound)
        b = jax.random.uniform(kb, (1, fan_out), jnp.float32, -bound, bound)
        params += [w, b]
    return params


def reference(embed, timesteps, params):
    """Pure-JAX layer-by-layer reference of the PyTorch forward (eval mode)."""
    t = timesteps.astype(jnp.float32) / 1000.0
    freqs = jnp.exp(
        jnp.arange(0, TIME_ENC_DIM, 2, dtype=jnp.float32)
        * -(math.log(10000.0) / TIME_ENC_DIM)
    )
    args = t[:, None] * freqs[None, :]
    enc = jnp.concatenate([jnp.sin(args), jnp.cos(args)], axis=1)
    x = jnp.concatenate([embed, enc], axis=1)
    for i in range(0, len(params), 2):
        x = x @ params[i] + params[i + 1]
    return x


if __name__ == "__main__":
    key = jax.random.PRNGKey(0)
    k_embed, k_time, k_params = jax.random.split(key, 3)
    params = init_params(k_params)

    run = jax.jit(sinusoidal_time_mlp)

    # Primary small-shape check (batch = 2).
    B = 2
    embed = jax.random.normal(k_embed, (B, INPUT_DIM), dtype=jnp.float32)
    timesteps = jax.random.randint(k_time, (B,), 0, 1000).astype(jnp.float32)
    out = jax.block_until_ready(run(embed, timesteps, params))
    ref = reference(embed, timesteps, params)
    assert out.shape == (B, 1)
    assert jnp.allclose(out, ref, atol=1e-3, rtol=1e-3), (out, ref)

    # Secondary check exercising row padding and the multi-step grid.
    B2 = 137
    k_e2, k_t2 = jax.random.split(k_embed)
    embed2 = jax.random.normal(k_e2, (B2, INPUT_DIM), dtype=jnp.float32)
    timesteps2 = jax.random.randint(k_t2, (B2,), 0, 1000).astype(jnp.float32)
    out2 = jax.block_until_ready(run(embed2, timesteps2, params))
    ref2 = reference(embed2, timesteps2, params)
    assert out2.shape == (B2, 1)
    assert jnp.allclose(out2, ref2, atol=1e-3, rtol=1e-3)

    print("KERNEL_OK")
</pallas_src>

<mosaic_0001>
module attributes {stable_mosaic.version = 11 : i64} {
  func.func @_sin_mlp_kernel(%arg0: i32, %arg1: memref<8x1xf32, #tpu.memory_space<vmem>>, %arg2: memref<8x768xf32, #tpu.memory_space<vmem>>, %arg3: memref<1x384xf32, #tpu.memory_space<vmem>>, %arg4: memref<768x128xf32, #tpu.memory_space<vmem>>, %arg5: memref<384x128xf32, #tpu.memory_space<vmem>>, %arg6: memref<384x128xf32, #tpu.memory_space<vmem>>, %arg7: memref<1x128xf32, #tpu.memory_space<vmem>>, %arg8: memref<8x128xf32, #tpu.memory_space<vmem>>) attributes {dimension_semantics = [#tpu.dimension_semantics<parallel>], iteration_bounds = array<i64: 1>, scalar_prefetch = 0 : i64, scratch_operands = 0 : i64, tpu.core_type = #tpu.core_type<tc>, window_params = [{transform_indices = @transform_0, window_bounds = array<i64: 8, 1>}, {transform_indices = @transform_1, window_bounds = array<i64: 8, 768>}, {pipeline_mode = #tpu.pipeline_mode<synchronous>, transform_indices = @transform_2, window_bounds = array<i64: 1, 384>}, {pipeline_mode = #tpu.pipeline_mode<synchronous>, transform_indices = @transform_3, window_bounds = array<i64: 768, 128>}, {pipeline_mode = #tpu.pipeline_mode<synchronous>, transform_indices = @transform_4, window_bounds = array<i64: 384, 128>}, {pipeline_mode = #tpu.pipeline_mode<synchronous>, transform_indices = @transform_5, window_bounds = array<i64: 384, 128>}, {pipeline_mode = #tpu.pipeline_mode<synchronous>, transform_indices = @transform_6, window_bounds = array<i64: 1, 128>}, {transform_indices = @transform_7, window_bounds = array<i64: 8, 128>}]} {
    %c0 = arith.constant 0 : index
    %c0_0 = arith.constant 0 : index
    %0 = vector.load %arg1[%c0, %c0_0] : memref<8x1xf32, #tpu.memory_space<vmem>>, vector<8x1xf32>
    %c0_1 = arith.constant 0 : index
    %c0_2 = arith.constant 0 : index
    %1 = vector.load %arg3[%c0_1, %c0_2] : memref<1x384xf32, #tpu.memory_space<vmem>>, vector<1x384xf32>
    %2 = vector.broadcast %0 : vector<8x1xf32> to vector<8x384xf32>
    %3 = vector.broadcast %1 : vector<1x384xf32> to vector<8x384xf32>
    %4 = arith.mulf %2, %3 : vector<8x384xf32>
    %5 = math.sin %4 : vector<8x384xf32>
    %6 = math.cos %4 : vector<8x384xf32>
    %c0_3 = arith.constant 0 : index
    %c0_4 = arith.constant 0 : index
    %7 = vector.load %arg2[%c0_3, %c0_4] : memref<8x768xf32, #tpu.memory_space<vmem>>, vector<8x768xf32>
    %c0_5 = arith.constant 0 : index
    %c0_6 = arith.constant 0 : index
    %8 = vector.load %arg4[%c0_5, %c0_6] : memref<768x128xf32, #tpu.memory_space<vmem>>, vector<768x128xf32>
    %cst = arith.constant dense<0.000000e+00> : vector<8x128xf32>
    %9 = tpu.matmul %7, %8, %cst {dimension_numbers = #tpu.dot_dimension_numbers<[1], [0], [0], [1], [0, 0, 1, 1], [], []>} : vector<8x768xf32>, vector<768x128xf32>, vector<8x128xf32> -> vector<8x128xf32>
    %c0_7 = arith.constant 0 : index
    %c0_8 = arith.constant 0 : index
    %10 = vector.load %arg5[%c0_7, %c0_8] : memref<384x128xf32, #tpu.memory_space<vmem>>, vector<384x128xf32>
    %cst_9 = arith.constant dense<0.000000e+00> : vector<8x128xf32>
    %11 = tpu.matmul %5, %10, %cst_9 {dimension_numbers = #tpu.dot_dimension_numbers<[1], [0], [0], [1], [0, 0, 1, 1], [], []>} : vector<8x384xf32>, vector<384x128xf32>, vector<8x128xf32> -> vector<8x128xf32>
    %12 = arith.addf %9, %11 : vector<8x128xf32>
    %c0_10 = arith.constant 0 : index
    %c0_11 = arith.constant 0 : index
    %13 = vector.load %arg6[%c0_10, %c0_11] : memref<384x128xf32, #tpu.memory_space<vmem>>, vector<384x128xf32>
    %cst_12 = arith.constant dense<0.000000e+00> : vector<8x128xf32>
    %14 = tpu.matmul %6, %13, %cst_12 {dimension_numbers = #tpu.dot_dimension_numbers<[1], [0], [0], [1], [0, 0, 1, 1], [], []>} : vector<8x384xf32>, vector<384x128xf32>, vector<8x128xf32> -> vector<8x128xf32>
    %15 = arith.addf %12, %14 : vector<8x128xf32>
    %c0_13 = arith.constant 0 : index
    %c0_14 = arith.constant 0 : index
    %16 = vector.load %arg7[%c0_13, %c0_14] : memref<1x128xf32, #tpu.memory_space<vmem>>, vector<1x128xf32>
    %17 = vector.broadcast %16 : vector<1x128xf32> to vector<8x128xf32>
    %18 = arith.addf %15, %17 : vector<8x128xf32>
    %c0_15 = arith.constant 0 : index
    %c0_16 = arith.constant 0 : index
    %19 = vector.load %arg8[%c0_15, %c0_16] : memref<8x128xf32, #tpu.memory_space<vmem>>, vector<8x128xf32>
    tpu.vector_store %arg8[%c0_15, %c0_16], %18 {strides = array<i32>} : memref<8x128xf32, #tpu.memory_space<vmem>>, vector<8x128xf32>,
    return
  }
  func.func @transform_0(%arg0: i32) -> (i32, i32) {
    %c0_i32 = arith.constant 0 : i32
    %c0_i32_0 = arith.constant 0 : i32
    return %arg0, %c0_i32 : i32, i32
  }
  func.func @transform_1(%arg0: i32) -> (i32, i32) {
    %c0_i32 = arith.constant 0 : i32
    %c0_i32_0 = arith.constant 0 : i32
    return %arg0, %c0_i32 : i32, i32
  }
  func.func @transform_2(%arg0: i32) -> (i32, i32) {
    %c0_i32 = arith.constant 0 : i32
    %c0_i32_0 = arith.constant 0 : i32
    %c0_i32_1 = arith.constant 0 : i32
    return %c0_i32, %c0_i32_0 : i32, i32
  }
  func.func @transform_3(%arg0: i32) -> (i32, i32) {
    %c0_i32 = arith.constant 0 : i32
    %c0_i32_0 = arith.constant 0 : i32
    %c0_i32_1 = arith.constant 0 : i32
    return %c0_i32, %c0_i32_0 : i32, i32
  }
  func.func @transform_4(%arg0: i32) -> (i32, i32) {
    %c0_i32 = arith.constant 0 : i32
    %c0_i32_0 = arith.constant 0 : i32
    %c0_i32_1 = arith.constant 0 : i32
    return %c0_i32, %c0_i32_0 : i32, i32
  }
  func.func @transform_5(%arg0: i32) -> (i32, i32) {
    %c0_i32 = arith.constant 0 : i32
    %c0_i32_0 = arith.constant 0 : i32
    %c0_i32_1 = arith.constant 0 : i32
    return %c0_i32, %c0_i32_0 : i32, i32
  }
  func.func @transform_6(%arg0: i32) -> (i32, i32) {
    %c0_i32 = arith.constant 0 : i32
    %c0_i32_0 = arith.constant 0 : i32
    %c0_i32_1 = arith.constant 0 : i32
    return %c0_i32, %c0_i32_0 : i32, i32
  }
  func.func @transform_7(%arg0: i32) -> (i32, i32) {
    %c0_i32 = arith.constant 0 : i32
    %c0_i32_0 = arith.constant 0 : i32
    return %arg0, %c0_i32 : i32, i32
  }
}

</mosaic_0001>

<bundles_post_ra>
// kernel: sinusoidal_time_mlp.1
= control target key start
LH: loop header
LB: loop body
LE: loop exit
PB: predicated region body
PF: predicated region fallthrough
CT: control target
= control target key end

     0   :  { %v1922_v0 = vmov 0   ;;  %v1923_v2 = vmov 0.0|0.0   ;;  %vm1924_vm0 = vmmov 0   ;;  %v1925_v6 = vmov 0.0   ;;  %s2838_s0 = inlined_call_operand.vmem [shape: f32[8,1], index: 0, kind: input, shape index: {}]   ;;  %s2839_s4 = inlined_call_operand.vmem [shape: f32[384,128], index: 4, kind: input, shape index: {}]   ;;  %s2840_s3 = inlined_call_operand.vmem [shape: f32[768,128], index: 3, kind: input, shape index: {}]   ;;  %s2841_s2 = inlined_call_operand.vmem [shape: f32[1,384], index: 2, kind: input, shape index: {}]   ;;  %s2842_s1 = inlined_call_operand.vmem [shape: f32[8,768], index: 1, kind: input, shape index: {}]   ;;  %s2843_s5 = inlined_call_operand.vmem [shape: f32[384,128], index: 5, kind: input, shape index: {}]   ;;  %s2844_s6 = inlined_call_operand.vmem [shape: f32[1,128], index: 6, kind: input, shape index: {}]   ;;  %s2845_s7 = inlined_call_operand.vmem [shape: f32[8,128], index: 7, kind: output, shape index: {}]  }
   0x1   :  { %1909 = vset.pattern.permute.xlu0 %v1922_v0  ;;  %v26_v1 = vld [vmem:[%s2838_s0] sm:$0xff]  ;;  %1711 = vmatprep.subr.bf16.mxu1 %v1923_v2  ;;  %v792_v4 = vld [vmem:[%s2839_s4 + $0x88] sm:$0xff]  ;;  %v793_v13 = vld [vmem:[%s2839_s4 + $0x90] sm:$0xff] }
   0x2   :  { %30 = vperm.xlu0 %1909, %v26_v1   ;;  %v791_v3 = vld [vmem:[%s2839_s4 + $0x80] sm:$0xff]  ;;  %1641 = vmatprep.mubr.msk.f32.mxu1 %vm1924_vm0, %v1925_v6  ;;  %v808_v8 = vld [vmem:[%s2839_s4 + $0x108] sm:$0xff]  ;;  %v794_v14 = vld [vmem:[%s2839_s4 + $0x98] sm:$0xff] }
   0x3   :  { %v807_v5 = vld [vmem:[%s2839_s4 + $0x100] sm:$0xff]  ;;  %v1679_v7 = vpack.c.bf16 %v792_v4, %v791_v3  ;;  %v776_v10 = vld [vmem:[%s2839_s4 + $0x8] sm:$0xff]  ;;  %v809_v15 = vld [vmem:[%s2839_s4 + $0x110] sm:$0xff]  ;;  %v1683_v16 = vpack.c.bf16 %v794_v14, %v793_v13 }
   0x4   :  { %v775_v9 = vld [vmem:[%s2839_s4] sm:$0xff]  ;;  %v1712_v11 = vpack.c.bf16 %v808_v8, %v807_v5  ;;  %v810_v17 = vld [vmem:[%s2839_s4 + $0x118] sm:$0xff]  ;;  %v777_v18 = vld [vmem:[%s2839_s4 + $0x10] sm:$0xff] }
   0x5   :  { %v1681_v12 = vpack.c.bf16 %v776_v10, %v775_v9  ;;  %1680 = vmatprep.subr.bf16.mxu0 %v1679_v7  ;;  %v778_v19 = vld [vmem:[%s2839_s4 + $0x18] sm:$0xff]  ;;  %v1715_v20 = vpack.c.bf16 %v810_v17, %v809_v15  ;;  %v795_v22 = vld [vmem:[%s2839_s4 + $0xa0] sm:$0xff]  ;;  %v796_v23 = vld [vmem:[%s2839_s4 + $0xa8] sm:$0xff] }
   0x6   :  { %1713 = vmatpush3.bf16.msra.mxu1 %v1712_v11  ;;  %v1685_v21 = vpack.c.bf16 %v778_v19, %v777_v18  ;;  %v811_v24 = vld [vmem:[%s2839_s4 + $0x120] sm:$0xff]  ;;  %v1687_v25 = vpack.c.bf16 %v796_v23, %v795_v22  ;;  %v812_v26 = vld [vmem:[%s2839_s4 + $0x128] sm:$0xff]  ;;  %v797_v29 = vld [vmem:[%s2839_s4 + $0xb0] sm:$0xff] }
   0x7   :  { %1682 = vmatpush3.bf16.msra.mxu0 %v1681_v12  ;;  %1714 = vmatprep.subr.bf16.mxu1 %v1923_v2  ;;  %v779_v27 = vld [vmem:[%s2839_s4 + $0x20] sm:$0xff]  ;;  %v780_v28 = vld [vmem:[%s2839_s4 + $0x28] sm:$0xff]  ;;  %v798_v30 = vld [vmem:[%s2839_s4 + $0xb8] sm:$0xff]  ;;  %v1718_v31 = vpack.c.bf16 %v812_v26, %v811_v24 }
   0x8   :  { %1684 = vmatprep.subr.bf16.mxu0 %v1683_v16  ;;  %v1689_v32 = vpack.c.bf16 %v780_v28, %v779_v27  ;;  %v813_v33 = vld [vmem:[%s2839_s4 + $0x130] sm:$0xff]  ;;  %v1691_v34 = vpack.c.bf16 %v798_v30, %v797_v29  ;;  %v814_v35 = vld [vmem:[%s2839_s4 + $0x138] sm:$0xff]  ;;  %v799_v38 = vld [vmem:[%s2839_s4 + $0xc0] sm:$0xff] }
   0x9   :  { %v781_v36 = vld [vmem:[%s2839_s4 + $0x30] sm:$0xff]  ;;  %v782_v37 = vld [vmem:[%s2839_s4 + $0x38] sm:$0xff]  ;;  %v800_v39 = vld [vmem:[%s2839_s4 + $0xc8] sm:$0xff]  ;;  %v1721_v40 = vpack.c.bf16 %v814_v35, %v813_v33 }
   0xa   :  { %1716 = vmatpush3.bf16.msra.mxu1 %v1715_v20  ;;  %v1693_v41 = vpack.c.bf16 %v782_v37, %v781_v36  ;;  %v815_v42 = vld [vmem:[%s2839_s4 + $0x140] sm:$0xff]  ;;  %v1695_v43 = vpack.c.bf16 %v800_v39, %v799_v38  ;;  %v816_v44 = vld [vmem:[%s2839_s4 + $0x148] sm:$0xff]  ;;  %v801_v47 = vld [vmem:[%s2839_s4 + $0xd0] sm:$0xff]  ;;  %v34_v20 = vlaneseq }
   0xb   :  { %1686 = vmatpush3.bf16.msra.mxu0 %v1685_v21  ;;  %1717 = vmatprep.subr.bf16.mxu1 %v1923_v2  ;;  %v783_v45 = vld [vmem:[%s2839_s4 + $0x40] sm:$0xff]  ;;  %v784_v46 = vld [vmem:[%s2839_s4 + $0x48] sm:$0xff]  ;;  %v802_v48 = vld [vmem:[%s2839_s4 + $0xd8] sm:$0xff]  ;;  %v1724_v49 = vpack.c.bf16 %v816_v44, %v815_v42 }
   0xc   :  { %1688 = vmatprep.subr.bf16.mxu0 %v1687_v25  ;;  %v1697_v50 = vpack.c.bf16 %v784_v46, %v783_v45  ;;  %v817_v51 = vld [vmem:[%s2839_s4 + $0x150] sm:$0xff]  ;;  %v1699_v52 = vpack.c.bf16 %v802_v48, %v801_v47  ;;  %v818_v53 = vld [vmem:[%s2839_s4 + $0x158] sm:$0xff]  ;;  %v803_v56 = vld [vmem:[%s2839_s4 + $0xe0] sm:$0xff]  ;;  %v35_v21 = vshrl.u32 %v34_v20, 7  ;;  %v1931_v20 = vmov 2131351028  }
   0xd   :  { %v785_v54 = vld [vmem:[%s2839_s4 + $0x50] sm:$0xff]  ;;  %v786_v55 = vld [vmem:[%s2839_s4 + $0x58] sm:$0xff]  ;;  %v804_v57 = vld [vmem:[%s2839_s4 + $0xe8] sm:$0xff]  ;;  %v1727_v58 = vpack.c.bf16 %v818_v53, %v817_v51 }
   0xe   :  { %1719 = vmatpush3.bf16.msra.mxu1 %v1718_v31  ;;  %v1701_v59 = vpack.c.bf16 %v786_v55, %v785_v54  ;;  %v819_v60 = vld [vmem:[%s2839_s4 + $0x160] sm:$0xff]  ;;  %v1703_v61 = vpack.c.bf16 %v804_v57, %v803_v56  ;;  %v820_v62 = vld [vmem:[%s2839_s4 + $0x168] sm:$0xff]  ;;  %v805_v1 = vld [vmem:[%s2839_s4 + $0xf0] sm:$0xff]  ;;  %v36_v22 = vsub.s32 0, %v35_v21  ;;  %v40_v23 = vsub.s32 1, %v35_v21 }
   0xf   :  { %1690 = vmatpush3.bf16.msra.mxu0 %v1689_v32  ;;  %1720 = vmatprep.subr.bf16.mxu1 %v1923_v2  ;;  %v787_v63 = vld [vmem:[%s2839_s4 + $0x60] sm:$0xff]  ;;  %v788_v0 = vld [vmem:[%s2839_s4 + $0x68] sm:$0xff]  ;;  %v806_v3 = vld [vmem:[%s2839_s4 + $0xf8] sm:$0xff]  ;;  %v1730_v4 = vpack.c.bf16 %v820_v62, %v819_v60  ;;  %v44_v24 = vsub.s32 2, %v35_v21 }
  0x10   :  { %1692 = vmatprep.subr.bf16.mxu0 %v1691_v34  ;;  %v1705_v5 = vpack.c.bf16 %v788_v0, %v787_v63  ;;  %v821_v7 = vld [vmem:[%s2839_s4 + $0x170] sm:$0xff]  ;;  %v1707_v8 = vpack.c.bf16 %v806_v3, %v805_v1  ;;  %v822_v9 = vld [vmem:[%s2839_s4 + $0x178] sm:$0xff]  ;;  %v727_v12 = vld [vmem:[%s2840_s3 + $0x180] sm:$0xff] }
  0x11   :  { %v789_v10 = vld [vmem:[%s2839_s4 + $0x70] sm:$0xff]  ;;  %v790_v11 = vld [vmem:[%s2839_s4 + $0x78] sm:$0xff]  ;;  %v728_v13 = vld [vmem:[%s2840_s3 + $0x188] sm:$0xff]  ;;  %v1733_v14 = vpack.c.bf16 %v822_v9, %v821_v7  ;;  %v1927_v7 = vmov 920167782  }
  0x12   :  { %1722 = vmatpush3.bf16.msra.mxu1 %v1721_v40  ;;  %v1709_v15 = vpack.c.bf16 %v790_v11, %v789_v10  ;;  %v1767_v16 = vpack.c.bf16 %v728_v13, %v727_v12  ;;  %v695_v17 = vld [vmem:[%s2840_s3 + $0x80] sm:$0xff]  ;;  %v696_v18 = vld [vmem:[%s2840_s3 + $0x88] sm:$0xff]  ;;  %v1928_v13 = vmov 2475754826  }
  0x13   :  { %1694 = vmatpush3.bf16.msra.mxu0 %v1693_v41  ;;  %1723 = vmatprep.subr.bf16.mxu1 %v1923_v2  ;;  %v1735_v19 = vpack.c.bf16 %v696_v18, %v695_v17  ;;  %v27_v25 = vld [vmem:[%s2841_s2] sm:$0x7]  ;;  %v1930_v17 = vmov 683565275  }
  0x14   :  { %1696 = vmatprep.subr.bf16.mxu0 %v1695_v43  ;;  %v37_v26 = vrot.slane %v27_v25, %v36_v22  ;;  %v41_v27 = vrot.slane %v27_v25, %v40_v23  ;;  %v45_v28 = vrot.slane %v27_v25, %v44_v24 }
  0x16   :  { %1725 = vmatpush3.bf16.msra.mxu1 %v1724_v49 }
  0x17   :  { %1698 = vmatpush3.bf16.msra.mxu0 %v1697_v50  ;;  %1726 = vmatprep.subr.bf16.mxu1 %v1923_v2 }
  0x18   :  { %1700 = vmatprep.subr.bf16.mxu0 %v1699_v52 }
  0x1a   :  { %1728 = vmatpush3.bf16.msra.mxu1 %v1727_v58 }
  0x1b   :  { %1702 = vmatpush3.bf16.msra.mxu0 %v1701_v59  ;;  %1729 = vmatprep.subr.bf16.mxu1 %v1923_v2 }
  0x1c   :  { %1704 = vmatprep.subr.bf16.mxu0 %v1703_v61 }
  0x1e   :  { %1731 = vmatpush3.bf16.msra.mxu1 %v1730_v4  ;;  %v1926_v4 = vmov 2102212464  }
  0x1f   :  { %1706 = vmatpush3.bf16.msra.mxu0 %v1705_v5  ;;  %1732 = vmatprep.subr.bf16.mxu1 %v1923_v2 }
  0x20   :  { %1708 = vmatprep.subr.bf16.mxu0 %v1707_v8 }
  0x22   :  { %1734 = vmatpush3.bf16.msra.mxu1 %v1733_v14 }
  0x23   :  { %1710 = vmatpush3.bf16.msra.mxu0 %v1709_v15  ;;  %1768 = vmatprep.subr.bf16.mxu1 %v1767_v16  ;;  %v1929_v15 = vmov 1326507024  }
  0x24   :  { %1736 = vmatprep.subr.bf16.mxu0 %v1735_v19 }
  0x81   :  { %v31_v29 = vpop.permute.xlu0 %30 }
  0x82   :  { %v2144_v30 = vmul.f32 %v37_v26, %v31_v29  ;;  %v2146_v31 = vmul.f32 %v41_v27, %v31_v29  ;;  %v2148_v32 = vmul.f32 %v45_v28, %v31_v29 }
  0x84   :  { %v55_v33 = vand.u32 2139095040, %v2144_v30  ;;  %v159_v34 = vand.u32 2139095040, %v2146_v31  ;;  %v263_v35 = vand.u32 2139095040, %v2148_v32  ;;  %v156_v36 = vand.u32 2147483647, %v2146_v31 }
  0x85   :  { %v260_v37 = vand.u32 2147483647, %v2148_v32  ;;  %v52_v46 = vand.u32 2147483647, %v2144_v30 }
  0x86   :  { %v56_v38 = vshrl.u32 %v55_v33, 23  ;;  %v160_v39 = vshrl.u32 %v159_v34, 23  ;;  %v264_v40 = vshrl.u32 %v263_v35, 23  ;;  %v163_v41 = vand.u32 8388607, %v156_v36 }
  0x87   :  { %v267_v45 = vand.u32 8388607, %v260_v37  ;;  %v2162_v55 = vand.u32 8388607, %v52_v46 }
  0x88   :  { %v1375_v42 = vadd.s32 4294967169, %v56_v38  ;;  %v1379_v43 = vadd.s32 4294967169, %v160_v39  ;;  %v1383_v44 = vadd.s32 4294967169, %v264_v40  ;;  %v164_v50 = vor.u32 8388608, %v163_v41 }
  0x89   :  { %v268_v51 = vor.u32 8388608, %v267_v45  ;;  %v60_v1 = vor.u32 8388608, %v2162_v55 }
  0x8a   :  { %v62_v47 = vadd.s32 1, %v1375_v42  ;;  %v166_v48 = vadd.s32 1, %v1379_v43  ;;  %v270_v49 = vadd.s32 1, %v1383_v44  ;;  %v2171_v60 = vshll.u32 %v164_v50, 8 }
  0x8b   :  { %v2173_v61 = vshll.u32 %v268_v51, 8 }
  0x8c   :  { %vm63_vm1 = vcmp.gt.s32.totalorder %v62_v47, 0  ;;  %vm167_vm2 = vcmp.gt.s32.totalorder %v166_v48, 0  ;;  %vm271_vm3 = vcmp.gt.s32.totalorder %v270_v49, 0 }
  0x8d   :  { %v64_v52 = vsel %vm63_vm1, %v62_v47, 0  ;;  %v168_v53 = vsel %vm167_vm2, %v166_v48, 0  ;;  %v272_v54 = vsel %vm271_vm3, %v270_v49, 0 }
  0x8e   :  { %v2164_v56 = vand.u32 31, %v64_v52  ;;  %v170_v57 = vand.u32 31, %v168_v53  ;;  %v2166_v58 = vand.u32 31, %v272_v54  ;;  %v2175_v63 = vshrl.u32 %v272_v54, 5 }
  0x8f   :  { %v2181_v3 = vshrl.u32 %v64_v52, 5  ;;  %v169_v9 = vshrl.u32 %v168_v53, 5 }
  0x90   :  { %v2169_v59 = vsub.s32 32, %v2164_v56  ;;  %v171_v62 = vsub.s32 32, %v170_v57  ;;  %v2178_v0 = vsub.s32 32, %v2166_v58  ;;  %v78_v5 = vshll.u32 %v1926_v4, %v2164_v56 }
  0x91   :  { %v2186_v8 = vshll.u32 %v1927_v7, %v2164_v56  ;;  %v286_v11 = vshll.u32 %v1926_v4, %v2166_v58  ;;  %v173_v18 = vshll.u32 %v1930_v17, %v170_v57  ;;  %v176_v19 = vshll.u32 %v1928_v13, %v170_v57 }
  0x92   :  { %v79_v10 = vshrl.u32 %v1927_v7, %v2169_v59  ;;  %v287_v12 = vshrl.u32 %v1927_v7, %v2178_v0  ;;  %v174_v14 = vshrl.u32 %v1928_v13, %v171_v62  ;;  %v290_v16 = vshrl.u32 %v1929_v15, %v2178_v0 }
  0x93   :  { %v177_v21 = vshrl.u32 %v1931_v20, %v171_v62  ;;  %v2198_v22 = vshrl.u32 %v1929_v15, %v2169_v59  ;;  %v289_v23 = vshll.u32 %v1927_v7, %v2166_v58  ;;  %vm295_vm4 = vcmp.lt.s32.totalorder %v2175_v63, 4 }
  0x94   :  { %v172_v24 = vshrl.u32 %v1930_v17, %v171_v62  ;;  %v175_v25 = vor.u32 %v174_v14, %v173_v18  ;;  %v179_v27 = vshll.u32 %v1931_v20, %v170_v57  ;;  %v180_v28 = vshrl.u32 %v1926_v4, %v171_v62 }
  0x95   :  { %v178_v26 = vor.u32 %v177_v21, %v176_v19  ;;  %v2205_v29 = vor.u32 %v79_v10, %v78_v5  ;;  %v288_v33 = vor.u32 %v287_v12, %v286_v11  ;;  %v182_v34 = vshll.u32 %v1926_v4, %v170_v57 }
  0x96   :  { %v183_v35 = vshrl.u32 %v1927_v7, %v171_v62  ;;  %v291_v38 = vor.u32 %v290_v16, %v289_v23  ;;  %v181_v39 = vor.u32 %v180_v28, %v179_v27  ;;  %v185_v40 = vshll.u32 %v1927_v7, %v170_v57 }
  0x97   :  { %v186_v41 = vshrl.u32 %v1929_v15, %v171_v62  ;;  %vm188_vm5 = vcmp.lt.s32.totalorder %v169_v9, 1  ;;  %vm190_vm6 = vcmp.lt.s32.totalorder %v169_v9, 3  ;;  %vm191_vm7 = vcmp.lt.s32.totalorder %v169_v9, 4 }
  0x98   :  { %v184_v42 = vor.u32 %v183_v35, %v182_v34  ;;  %v192_v44 = vsel %vm188_vm5, %v172_v24, %v175_v25  ;;  %v193_v45 = vsel %vm191_vm7, %v181_v39, 2102212464  ;;  %v196_v47 = vsel %vm188_vm5, %v175_v25, %v178_v26 }
  0x99   :  { %v187_v43 = vor.u32 %v186_v41, %v185_v40  ;;  %vm189_vm8 = vcmp.lt.s32.totalorder %v169_v9, 2  ;;  %v194_v48 = vsel %vm190_vm6, %v178_v26, %v193_v45  ;;  %v200_v50 = vsel %vm188_vm5, %v178_v26, %v181_v39 }
  0x9a   :  { %v197_v49 = vsel %vm191_vm7, %v184_v42, 920167782  ;;  %v305_v51 = vsel %vm295_vm4, %v291_v38, 1326507024  ;;  %v195_v52 = vsel %vm189_vm8, %v192_v44, %v194_v48  ;;  %v277_v5 = vshll.u32 %v1930_v17, %v2166_v58 }
  0x9b   :  { %v198_v53 = vsel %vm190_vm6, %v181_v39, %v197_v49  ;;  %v201_v54 = vsel %vm191_vm7, %v187_v43, 1326507024  ;;  %v278_v7 = vshrl.u32 %v1928_v13, %v2178_v0  ;;  %v280_v12 = vshll.u32 %v1928_v13, %v2166_v58 }
  0x9c   :  { %v199_v57 = vsel %vm189_vm8, %v196_v47, %v198_v53  ;;  %v202_v62 = vsel %vm190_vm6, %v184_v42, %v201_v54  ;;  %v281_v18 = vshrl.u32 %v1931_v20, %v2178_v0  ;;  %v83_v19 = vor.u32 %v2198_v22, %v2186_v8 }
  0x9d   :  { %v203_v10 = vsel %vm189_vm8, %v200_v50, %v202_v62  ;;  %v2215_v9 = vmul.u32.u64.low %v2171_v60, %v199_v57  ;;  %v2216_v11 = vmul.u32.u64.high %v2171_v60, %v199_v57, %v2215_v9  ;;  %v279_v16 = vor.u32 %v278_v7, %v277_v5 }
  0x9e   :  { %v2222_v14 = vmul.u32.u64.low %v2171_v60, %v203_v10  ;;  %v2223_v15 = vmul.u32.u64.high %v2171_v60, %v203_v10, %v2222_v14  ;;  %vm87_vm9 = vcmp.lt.s32.totalorder %v2181_v3, 4  ;;  %v301_v21 = vsel %vm295_vm4, %v288_v33, 920167782 }
  0x9f   :  { %v283_v23 = vshll.u32 %v1931_v20, %v2166_v58  ;;  %v284_v24 = vshrl.u32 %v1926_v4, %v2178_v0  ;;  %v211_v25 = vmul.u32 %v2171_v60, %v195_v52  ;;  %v276_v26 = vshrl.u32 %v1930_v17, %v2178_v0 }
  0xa0   :  { %v282_v27 = vor.u32 %v281_v18, %v280_v12  ;;  %vm294_vm10 = vcmp.lt.s32.totalorder %v2175_v63, 3  ;;  %v214_v8 = vadd.s32 1, %v2216_v11  ;;  %vm292_vm11 = vcmp.lt.s32.totalorder %v2175_v63, 1 }
  0xa1   :  { %v285_v22 = vor.u32 %v284_v24, %v283_v23  ;;  %v306_v28 = vsel %vm294_vm10, %v288_v33, %v305_v51  ;;  %vm213_vm12 = vc.u32 %v2223_v15, %v2215_v9  ;;  %vm293_vm13 = vcmp.lt.s32.totalorder %v2175_v63, 2 }
  0xa2   :  { %v300_v58 = vsel %vm292_vm11, %v279_v16, %v282_v27  ;;  %v70_v60 = vshrl.u32 %v1928_v13, %v2169_v59  ;;  %v215_v0 = vsel %vm213_vm12, %v214_v8, %v2216_v11  ;;  %v69_v41 = vshll.u32 %v1930_v17, %v2164_v56 }
  0xa3   :  { %v297_v34 = vsel %vm295_vm4, %v285_v22, 2102212464  ;;  %v302_v35 = vsel %vm294_vm10, %v285_v22, %v301_v21  ;;  %v304_v38 = vsel %vm292_vm11, %v282_v27, %v285_v22  ;;  %v216_v39 = vadd.s32 %v215_v0, %v211_v25 }
  0xa4   :  { %v303_v33 = vsel %vm293_vm13, %v300_v58, %v302_v35  ;;  %v307_v40 = vsel %vm293_vm13, %v304_v38, %v306_v28  ;;  %v296_v42 = vsel %vm292_vm11, %v276_v26, %v279_v16  ;;  %v298_v43 = vsel %vm294_vm10, %v282_v27, %v297_v34 }
  0xa5   :  { %v2263_v44 = vmul.u32.u64.low %v2173_v61, %v307_v40  ;;  %v2264_v45 = vmul.u32.u64.high %v2173_v61, %v307_v40, %v2263_v44  ;;  %v217_v47 = vadd.s32 536870912, %v216_v39  ;;  %v71_v50 = vor.u32 %v70_v60, %v69_v41 }
  0xa6   :  { %v2267_v48 = vmul.u32.u64.low %v2173_v61, %v303_v33  ;;  %v2268_v49 = vmul.u32.u64.high %v2173_v61, %v303_v33, %v2267_v48  ;;  %v72_v51 = vshll.u32 %v1928_v13, %v2164_v56  ;;  %v73_v52 = vshrl.u32 %v1931_v20, %v2169_v59 }
  0xa7   :  { %v75_v53 = vshll.u32 %v1931_v20, %v2164_v56  ;;  %v76_v54 = vshrl.u32 %v1926_v4, %v2169_v59  ;;  %v93_v57 = vsel %vm87_vm9, %v2205_v29, 920167782  ;;  %v97_v62 = vsel %vm87_vm9, %v83_v19, 1326507024 }
  0xa8   :  { %v2284_v5 = vshrl.u32 %v217_v47, 30  ;;  %v299_v13 = vsel %vm293_vm13, %v296_v42, %v298_v43  ;;  %vm317_vm14 = vc.u32 %v2264_v45, %v2267_v48  ;;  %v68_v56 = vshrl.u32 %v1930_v17, %v2169_v59 }
  0xa9   :  { %v74_v20 = vor.u32 %v73_v52, %v72_v51  ;;  %v77_v4 = vor.u32 %v76_v54, %v75_v53  ;;  %v318_v10 = vadd.s32 1, %v2268_v49  ;;  %vm84_vm15 = vcmp.lt.s32.totalorder %v2181_v3, 1 }
  0xaa   :  { %v219_v7 = vshll.u32 %v2284_v5, 30  ;;  %vm86_vm1 = vcmp.lt.s32.totalorder %v2181_v3, 3  ;;  %v315_v11 = vmul.u32 %v2173_v61, %v299_v13  ;;  %vm85_vm2 = vcmp.lt.s32.totalorder %v2181_v3, 2 }
  0xab   :  { %v89_v63 = vsel %vm87_vm9, %v77_v4, 2102212464  ;;  %v92_v12 = vsel %vm84_vm15, %v71_v50, %v74_v20  ;;  %v94_v14 = vsel %vm86_vm1, %v77_v4, %v93_v57  ;;  %v319_v59 = vsel %vm317_vm14, %v318_v10, %v2268_v49 }
  0xac   :  { %v220_v16 = vsub.s32 %v216_v39, %v219_v7  ;;  %v96_v17 = vsel %vm84_vm15, %v74_v20, %v77_v4  ;;  %v320_v18 = vadd.s32 %v319_v59, %v315_v11  ;;  %v95_v19 = vsel %vm85_vm2, %v92_v12, %v94_v14 }
  0xad   :  { %v100_v21 = vshll.u32 %v60_v1, 8  ;;  %v88_v24 = vsel %vm84_vm15, %v68_v56, %v71_v50  ;;  %v90_v25 = vsel %vm86_vm1, %v74_v20, %v89_v63  ;;  %v98_v61 = vsel %vm86_vm1, %v2205_v29, %v97_v62 }
  0xae   :  { %v222_v23 = vsub.s32 0, %v220_v16  ;;  %v321_v26 = vadd.s32 536870912, %v320_v18  ;;  %v99_v27 = vsel %vm85_vm2, %v96_v17, %v98_v61  ;;  %v91_v0 = vsel %vm85_vm2, %v88_v24, %v90_v25 }
  0xaf   :  { %v2304_v8 = vmul.u32.u64.low %v100_v21, %v95_v19  ;;  %v2305_v22 = vmul.u32.u64.high %v100_v21, %v95_v19, %v2304_v8  ;;  %v2308_v58 = vmul.u32.u64.low %v100_v21, %v99_v27  ;;  %v2309_v3 = vmul.u32.u64.high %v100_v21, %v99_v27, %v2308_v58 }
  0xb0   :  { %v1380_v28 = vmin.u32 %v222_v23, %v220_v16  ;;  %v2311_v60 = vshrl.u32 %v321_v26, 30  ;;  %v107_v29 = vmul.u32 %v100_v21, %v91_v0  ;;  %v212_v42 = vadd.s32 %v2215_v9, %v2223_v15 }
  0xb1   :  { %v110_v34 = vadd.s32 1, %v2305_v22  ;;  %vm109_vm3 = vc.u32 %v2309_v3, %v2304_v8  ;;  %v242_v11 = vsub.s32 4, %v2284_v5  ;;  %v316_v63 = vadd.s32 %v2267_v48, %v2264_v45 }
  0xb2   :  { %v224_v55 = vclz %v1380_v28  ;;  %v323_v1 = vshll.u32 %v2311_v60, 30  ;;  %vm158_vm6 = vcmp.lt.s32.totalorder %v2146_v31, 0  ;;  %vm157_vm7 = vcmp.le.f32.partialorder %v156_v36, 0.7853982 }
  0xb3   :  { %v111_v39 = vsel %vm109_vm3, %v110_v34, %v2305_v22  ;;  %v243_v24 = vsel %vm158_vm6, %v242_v11, %v2284_v5  ;;  %v108_v5 = vadd.s32 %v2304_v8, %v2309_v3  ;;  %v346_v36 = vsub.s32 4, %v2311_v60  ;;  %v711_v11 = vld [vmem:[%s2840_s3 + $0x100] sm:$0xff] }
  0xb4   :  { %v1381_v35 = vadd.s32 4294967294, %v224_v55  ;;  %v324_v38 = vsub.s32 %v320_v18, %v323_v1  ;;  %v112_v33 = vadd.s32 %v111_v39, %v107_v29  ;;  %v2331_v22 = vsel %vm157_vm7, 0, %v243_v24 }
  0xb5   :  { %vm262_vm9 = vcmp.lt.s32.totalorder %v2148_v32, 0  ;;  %vm261_vm10 = vcmp.le.f32.partialorder %v260_v37, 0.7853982  ;;  %vm248_vm14 = vweird.f32 %v2146_v31  ;;  %vm54_vm15 = vcmp.lt.s32.totalorder %v2144_v30, 0 }
  0xb6   :  { %vm1382_vm4 = vcmp.lt.s32.totalorder %v1381_v35, 0  ;;  %v326_v41 = vsub.s32 0, %v324_v38  ;;  %v113_v47 = vadd.s32 536870912, %v112_v33  ;;  %v347_v8 = vsel %vm262_vm9, %v346_v36, %v2311_v60 }
  0xb7   :  { %v227_v40 = vsel %vm1382_vm4, 0, %v1381_v35  ;;  %v249_v35 = vadd.s32 3, %v2331_v22  ;;  %vm53_vm1 = vcmp.le.f32.partialorder %v52_v46, 0.7853982 }
  0xb8   :  { %v228_v43 = vsub.s32 32, %v227_v40  ;;  %v232_v44 = vsub.s32 4294967266, %v227_v40  ;;  %v1384_v49 = vmin.u32 %v326_v41, %v324_v38  ;;  %v229_v50 = vshll.u32 %v220_v16, %v227_v40 }
  0xb9   :  { %v2320_v53 = vshrl.u32 %v113_v47, 30  ;;  %v250_v3 = vand.u32 3, %v249_v35  ;;  %v680_v35 = vld [vmem:[%s2840_s3 + $0x8] sm:$0xff] }
  0xba   :  { %v230_v51 = vshrl.u32 %v212_v42, %v228_v43  ;;  %v233_v52 = vadd.s32 127, %v232_v44  ;;  %v328_v54 = vclz %v1384_v49  ;;  %v349_v49 = vsel %vm261_vm10, 0, %v347_v8 }
  0xbb   :  { %v115_v13 = vshll.u32 %v2320_v53, 30  ;;  %vm255_vm11 = vcmp.eq.s32.totalorder %v250_v3, 2  ;;  %v138_v60 = vsub.s32 4, %v2320_v53  ;;  %vm252_vm12 = vcmp.eq.s32.totalorder %v250_v3, 0 }
  0xbc   :  { %v231_v57 = vor.u32 %v230_v51, %v229_v50  ;;  %v234_v62 = vshll.u32 %v233_v52, 23  ;;  %v1385_v56 = vadd.s32 4294967294, %v328_v54  ;;  %vm251_vm13 = vcmp.lt.s32.totalorder %v250_v3, 2 }
  0xbd   :  { %v116_v4 = vsub.s32 %v112_v33, %v115_v13  ;;  %v353_v13 = vadd.s32 3, %v349_v49 }
  0xbe   :  { %v235_v20 = vor.u32 4788187, %v234_v62  ;;  %vm1386_vm5 = vcmp.lt.s32.totalorder %v1385_v56, 0  ;;  %v238_v9 = vcvt.s32.f32 %v231_v57 }
  0xbf   :  { %v331_v15 = vsel %vm1386_vm5, 0, %v1385_v56  ;;  %v118_v10 = vsub.s32 0, %v116_v4 }
  0xc0   :  { %v236_v7 = vand.u32 2147483647, %v235_v20  ;;  %v332_v12 = vsub.s32 32, %v331_v15  ;;  %v336_v14 = vsub.s32 4294967266, %v331_v15  ;;  %v333_v17 = vshll.u32 %v324_v38, %v331_v15 }
  0xc1   :  { %v1376_v59 = vmin.u32 %v118_v10, %v116_v4  ;;  %v139_v15 = vsel %vm54_vm15, %v138_v60, %v2320_v53  ;;  %v354_v10 = vand.u32 3, %v353_v13 }
  0xc2   :  { %v239_v16 = vmul.f32 %v238_v9, %v236_v7  ;;  %v334_v18 = vshrl.u32 %v316_v63, %v332_v12  ;;  %v337_v19 = vadd.s32 127, %v336_v14  ;;  %v712_v63 = vld [vmem:[%s2840_s3 + $0x108] sm:$0xff]  ;;  %v663_v14 = vand.u32 3, %v349_v49 }
  0xc3   :  { %v120_v23 = vclz %v1376_v59  ;;  %v141_v59 = vsel %vm53_vm1, 0, %v139_v15  ;;  %v1769_v53 = vpack.c.bf16 %v712_v63, %v711_v11  ;;  %vm356_vm2 = vcmp.eq.s32.totalorder %v354_v10, 0  ;;  %v682_v11 = vld [vmem:[%s2840_s3 + $0x18] sm:$0xff]  ;;  %v735_v63 = vld [vmem:[%s2840_s3 + $0x1c0] sm:$0xff] }
  0xc4   :  { %v240_v21 = vxor.u32 2147483648, %v239_v16  ;;  %v335_v25 = vor.u32 %v334_v18, %v333_v17  ;;  %v338_v61 = vshll.u32 %v337_v19, 23  ;;  %vm359_vm3 = vcmp.eq.s32.totalorder %v354_v10, 2  ;;  %v729_v19 = vld [vmem:[%s2840_s3 + $0x190] sm:$0xff] }
  0xc5   :  { %v1377_v45 = vadd.s32 4294967294, %v120_v23  ;;  %vm668_vm4 = vcmp.eq.s32.totalorder %v663_v14, 2  ;;  %v145_v24 = vadd.s32 3, %v141_v59  ;;  %vm665_vm5 = vcmp.eq.s32.totalorder %v663_v14, 0 }
  0xc6   :  { %v241_v26 = vsel %vm158_vm6, %v240_v21, %v239_v16  ;;  %v339_v27 = vor.u32 4788187, %v338_v61  ;;  %v342_v58 = vcvt.s32.f32 %v335_v25  ;;  %v730_v21 = vld [vmem:[%s2840_s3 + $0x198] sm:$0xff]  ;;  %vm355_vm6 = vcmp.lt.s32.totalorder %v354_v10, 2 }
  0xc7   :  { %v244_v48 = vsel %vm157_vm7, %v2146_v31, %v241_v26  ;;  %vm1378_vm8 = vcmp.lt.s32.totalorder %v1377_v45, 0  ;;  %vm664_vm7 = vcmp.lt.s32.totalorder %v663_v14, 2  ;;  %v146_v36 = vand.u32 3, %v145_v24  ;;  %v720_v24 = vld [vmem:[%s2840_s3 + $0x148] sm:$0xff] }
  0xc8   :  { %1910 = vcosq.f32 %v244_v48  ;;  %v340_v28 = vand.u32 2147483647, %v339_v27  ;;  %v123_v0 = vsel %vm1378_vm8, 0, %v1377_v45  ;;  %vm352_vm8 = vweird.f32 %v2148_v32  ;;  %v713_v27 = vld [vmem:[%s2840_s3 + $0x110] sm:$0xff]  ;;  %v1178_v31 = vld [vmem:[%s2843_s5 + $0x28] sm:$0xff] }
  0xc9   :  { %1912 = vsinq.f32 %v244_v48  ;;  %v124_v55 = vsub.s32 32, %v123_v0  ;;  %v128_v1 = vsub.s32 4294967266, %v123_v0  ;;  %v125_v29 = vshll.u32 %v116_v4, %v123_v0 }
  0xca   :  { %v343_v34 = vmul.f32 %v342_v58, %v340_v28  ;;  %v1771_v48 = vpack.c.bf16 %v730_v21, %v729_v19  ;;  %v714_v28 = vld [vmem:[%s2840_s3 + $0x118] sm:$0xff]  ;;  %v683_v19 = vld [vmem:[%s2840_s3 + $0x20] sm:$0xff] }
  0xcb   :  { %v126_v38 = vshrl.u32 %v108_v5, %v124_v55  ;;  %v129_v39 = vadd.s32 127, %v128_v1  ;;  %v676_v58 = vld [vmem:[%s2842_s1 + $0x18] sm:$0xff]  ;;  %v731_v55 = vld [vmem:[%s2840_s3 + $0x1a0] sm:$0xff]  ;;  %v732_v1 = vld [vmem:[%s2840_s3 + $0x1a8] sm:$0xff] }
  0xcc   :  { %v344_v33 = vxor.u32 2147483648, %v343_v34  ;;  %v1775_v8 = vpack.c.bf16 %v732_v1, %v731_v55  ;;  %v722_v55 = vld [vmem:[%s2840_s3 + $0x158] sm:$0xff] }
  0xcd   :  { %v127_v40 = vor.u32 %v126_v38, %v125_v29  ;;  %v130_v41 = vshll.u32 %v129_v39, 23  ;;  %v715_v29 = vld [vmem:[%s2840_s3 + $0x120] sm:$0xff]  ;;  %v716_v38 = vld [vmem:[%s2840_s3 + $0x128] sm:$0xff]  ;;  %v457_v39 = vand.u32 3, %v141_v59 }
  0xce   :  { %v345_v42 = vsel %vm262_vm9, %v344_v33, %v343_v34  ;;  %v1773_v33 = vpack.c.bf16 %v714_v28, %v713_v27  ;;  %v1777_v49 = vpack.c.bf16 %v716_v38, %v715_v29  ;;  %vm151_vm9 = vcmp.eq.s32.totalorder %v146_v36, 2  ;;  %v699_v59 = vld [vmem:[%s2840_s3 + $0xa0] sm:$0xff]  ;;  %v702_v27 = vld [vmem:[%s2840_s3 + $0xb8] sm:$0xff]  ;;  %v740_v29 = vld [vmem:[%s2840_s3 + $0x1e8] sm:$0xff] }
  0xcf   :  { %v348_v43 = vsel %vm261_vm10, %v2148_v32, %v345_v42  ;;  %v131_v44 = vor.u32 4788187, %v130_v41  ;;  %v134_v51 = vcvt.s32.f32 %v127_v40  ;;  %v679_v32 = vld [vmem:[%s2840_s3] sm:$0xff]  ;;  %v733_v40 = vld [vmem:[%s2840_s3 + $0x1b0] sm:$0xff]  ;;  %v734_v41 = vld [vmem:[%s2840_s3 + $0x1b8] sm:$0xff]  ;;  %vm462_vm10 = vcmp.eq.s32.totalorder %v457_v39, 2 }
  0xd0   :  { %1914 = vcosq.f32 %v348_v43  ;;  %v1779_v60 = vpack.c.bf16 %v734_v41, %v733_v40  ;;  %v703_v38 = vld [vmem:[%s2840_s3 + $0xc0] sm:$0xff] }
  0xd1   :  { %1916 = vsinq.f32 %v348_v43  ;;  %v132_v50 = vand.u32 2147483647, %v131_v44  ;;  %v1737_v44 = vpack.c.bf16 %v680_v35, %v679_v32  ;;  %v721_v32 = vld [vmem:[%s2840_s3 + $0x150] sm:$0xff]  ;;  %v739_v35 = vld [vmem:[%s2840_s3 + $0x1e0] sm:$0xff] }
  0xd2   :  { %v2342_v47 = vpop.eup %1910  ;;  %v687_v41 = vld [vmem:[%s2840_s3 + $0x40] sm:$0xff] }
  0xd3   :  { %v2344_v52 = vpop.eup %1912  ;;  %v256_v54 = vxor.u32 2147483648, %v2342_v47  ;;  %v135_v57 = vmul.f32 %v134_v51, %v132_v50  ;;  %v697_v51 = vld [vmem:[%s2840_s3 + $0x90] sm:$0xff] }
  0xd4   :  { %v253_v37 = vxor.u32 2147483648, %v2344_v52 }
  0xd5   :  { %v257_v62 = vsel %vm255_vm11, %v256_v54, %v2344_v52  ;;  %v136_v20 = vxor.u32 2147483648, %v135_v57  ;;  %vm148_vm11 = vcmp.eq.s32.totalorder %v146_v36, 0 }
  0xd6   :  { %v254_v56 = vsel %vm252_vm12, %v2342_v47, %v253_v37  ;;  %vm459_vm12 = vcmp.eq.s32.totalorder %v457_v39, 0 }
  0xd7   :  { %v258_v4 = vsel %vm251_vm13, %v254_v56, %v257_v62  ;;  %v137_v9 = vsel %vm54_vm15, %v136_v20, %v135_v57  ;;  %v698_v57 = vld [vmem:[%s2840_s3 + $0x98] sm:$0xff]  ;;  %vm147_vm13 = vcmp.lt.s32.totalorder %v146_v36, 2  ;;  %v681_v20 = vld [vmem:[%s2840_s3 + $0x10] sm:$0xff]  ;;  %vm458_vm15 = vcmp.lt.s32.totalorder %v457_v39, 2  ;;  %v704_v39 = vld [vmem:[%s2840_s3 + $0xc8] sm:$0xff] }
  0xd8   :  { %v259_v7 = vsel %vm248_vm14, nan, %v258_v4  ;;  %v140_v12 = vsel %vm53_vm1, %v2144_v30, %v137_v9  ;;  %v717_v4 = vld [vmem:[%s2840_s3 + $0x130] sm:$0xff]  ;;  %vm144_vm1 = vweird.f32 %v2144_v30  ;;  %v1739_v10 = vpack.c.bf16 %v698_v57, %v697_v51  ;;  %v686_v36 = vld [vmem:[%s2840_s3 + $0x38] sm:$0xff] }
  0xd9   :  { %887 = vmatprep.mubr.f32.mxu0 %v259_v7  ;;  %1918 = vcosq.f32 %v140_v12  ;;  %v718_v7 = vld [vmem:[%s2840_s3 + $0x138] sm:$0xff]  ;;  %v705_v51 = vld [vmem:[%s2840_s3 + $0xd0] sm:$0xff] }
  0xda   :  { %v1915_v16 = vpop.eup %1914  ;;  %1920 = vsinq.f32 %v140_v12  ;;  %v736_v12 = vld [vmem:[%s2840_s3 + $0x1c8] sm:$0xff]  ;;  %v706_v57 = vld [vmem:[%s2840_s3 + $0xd8] sm:$0xff]  ;;  %v1207_v30 = vld [vmem:[%s2843_s5 + $0x110] sm:$0xff] }
  0xdb   :  { %v1917_v46 = vpop.eup %1916  ;;  %v360_v17 = vxor.u32 2147483648, %v1915_v16  ;;  %v1783_v21 = vpack.c.bf16 %v736_v12, %v735_v63  ;;  %v708_v63 = vld [vmem:[%s2840_s3 + $0xe8] sm:$0xff] }
  0xdc   :  { %v357_v18 = vxor.u32 2147483648, %v1917_v46 }
  0xdd   :  { %v361_v23 = vsel %vm359_vm3, %v360_v17, %v1917_v46  ;;  %v670_v25 = vsel %vm668_vm4, %v360_v17, %v1917_v46  ;;  %v700_v46 = vld [vmem:[%s2840_s3 + $0xa8] sm:$0xff] }
  0xde   :  { %v358_v61 = vsel %vm356_vm2, %v1915_v16, %v357_v18  ;;  %v667_v26 = vsel %vm665_vm5, %v1915_v16, %v357_v18  ;;  %v674_v17 = vld [vmem:[%s2842_s1 + $0x8] sm:$0xff]  ;;  %v1741_v18 = vpack.c.bf16 %v682_v11, %v681_v20  ;;  %v690_v20 = vld [vmem:[%s2840_s3 + $0x58] sm:$0xff]  ;;  %v707_v11 = vld [vmem:[%s2840_s3 + $0xe0] sm:$0xff] }
  0xdf   :  { %v362_v45 = vsel %vm355_vm6, %v358_v61, %v361_v23  ;;  %v671_v0 = vsel %vm664_vm7, %v667_v26, %v670_v25  ;;  %v719_v23 = vld [vmem:[%s2840_s3 + $0x140] sm:$0xff]  ;;  %v1743_v25 = vpack.c.bf16 %v700_v46, %v699_v59  ;;  %v684_v61 = vld [vmem:[%s2840_s3 + $0x28] sm:$0xff]  ;;  %v737_v26 = vld [vmem:[%s2840_s3 + $0x1d0] sm:$0xff] }
  0xe0   :  { %v363_v5 = vsel %vm352_vm8, nan, %v362_v45  ;;  %v2394_v34 = vsel %vm352_vm8, nan, %v671_v0  ;;  %v738_v45 = vld [vmem:[%s2840_s3 + $0x1d8] sm:$0xff]  ;;  %v1785_v28 = vpack.c.bf16 %v720_v24, %v719_v23  ;;  %v685_v0 = vld [vmem:[%s2840_s3 + $0x30] sm:$0xff]  ;;  %v691_v59 = vld [vmem:[%s2840_s3 + $0x60] sm:$0xff] }
  0xe1   :  { %1642 = vmatmul.mubr.f32.vlgmr.msra.gmra.mrb[0].mxu1 %v363_v5  ;;  %v1787_v5 = vpack.c.bf16 %v738_v45, %v737_v26  ;;  %v1749_v40 = vpack.c.bf16 %v686_v36, %v685_v0  ;;  %v692_v23 = vld [vmem:[%s2840_s3 + $0x68] sm:$0xff]  ;;  %v1191_v24 = vld [vmem:[%s2843_s5 + $0x90] sm:$0xff]  ;;  %v694_v0 = vld [vmem:[%s2840_s3 + $0x78] sm:$0xff] }
  0xe2   :  { %1770 = vmatpush3.bf16.msra.mxu1 %v1769_v53  ;;  %1097 = vmatprep.mubr.f32.mxu1 %v676_v58  ;;  %v1781_v53 = vpack.c.bf16 %v718_v7, %v717_v4  ;;  %v1745_v58 = vpack.c.bf16 %v684_v61, %v683_v19  ;;  %v725_v7 = vld [vmem:[%s2840_s3 + $0x170] sm:$0xff]  ;;  %v1761_v26 = vpack.c.bf16 %v692_v23, %v691_v59 }
  0xe3   :  { %v1919_v42 = vpop.eup %1918  ;;  %1772 = vmatprep.subr.bf16.mxu1 %v1771_v48  ;;  %v701_v48 = vld [vmem:[%s2840_s3 + $0xb0] sm:$0xff] }
  0xe4   :  { %v1921_v3 = vpop.eup %1920  ;;  %v152_v43 = vxor.u32 2147483648, %v1919_v42  ;;  %v1747_v1 = vpack.c.bf16 %v702_v27, %v701_v48  ;;  %v693_v45 = vld [vmem:[%s2840_s3 + $0x70] sm:$0xff] }
  0xe5   :  { %v149_v50 = vxor.u32 2147483648, %v1921_v3  ;;  %v1175_v27 = vld [vmem:[%s2843_s5 + $0x10] sm:$0xff] }
  0xe6   :  { %v153_v62 = vsel %vm151_vm9, %v152_v43, %v1921_v3  ;;  %1774 = vmatpush3.bf16.msra.mxu1 %v1773_v33  ;;  %v464_v13 = vsel %vm462_vm10, %v152_v43, %v1921_v3  ;;  %v1789_v33 = vpack.c.bf16 %v722_v55, %v721_v32  ;;  %v724_v3 = vld [vmem:[%s2840_s3 + $0x168] sm:$0xff]  ;;  %v1751_v43 = vpack.c.bf16 %v704_v39, %v703_v38  ;;  %v759_v55 = vld [vmem:[%s2840_s3 + $0x280] sm:$0xff] }
  0xe7   :  { %v150_v56 = vsel %vm148_vm11, %v1919_v42, %v149_v50  ;;  %1776 = vmatprep.subr.bf16.mxu1 %v1775_v8  ;;  %v461_v9 = vsel %vm459_vm12, %v1919_v42, %v149_v50  ;;  %v1791_v42 = vpack.c.bf16 %v740_v29, %v739_v35  ;;  %v723_v8 = vld [vmem:[%s2840_s3 + $0x160] sm:$0xff]  ;;  %v742_v50 = vld [vmem:[%s2840_s3 + $0x1f8] sm:$0xff]  ;;  %v1194_v32 = vld [vmem:[%s2843_s5 + $0xa8] sm:$0xff]  ;;  %v1765_v29 = vpack.c.bf16 %v694_v0, %v693_v45 }
  0xe8   :  { %v154_v15 = vsel %vm147_vm13, %v150_v56, %v153_v62  ;;  %v2436_v14 = vsel %vm458_vm15, %v461_v9, %v464_v13  ;;  %v1793_v62 = vpack.c.bf16 %v724_v3, %v723_v8  ;;  %v560_v13 = vand.u32 3, %v2331_v22  ;;  %v726_v9 = vld [vmem:[%s2840_s3 + $0x178] sm:$0xff]  ;;  %v1189_v22 = vld [vmem:[%s2843_s5 + $0x80] sm:$0xff]  ;;  %v761_v3 = vld [vmem:[%s2840_s3 + $0x290] sm:$0xff] }
  0xe9   :  { %v155_v16 = vsel %vm144_vm1, nan, %v154_v15  ;;  %v1755_v15 = vpack.c.bf16 %v706_v57, %v705_v51  ;;  %v743_v38 = vld [vmem:[%s2840_s3 + $0x200] sm:$0xff]  ;;  %v1196_v8 = vld [vmem:[%s2843_s5 + $0xb8] sm:$0xff]  ;;  %v745_v51 = vld [vmem:[%s2840_s3 + $0x210] sm:$0xff] }
  0xea   :  { %888 = vmatmul.mubr.f32.vlgmr.msra.gmra.mrb[0].mxu0 %v155_v16  ;;  %1778 = vmatpush3.bf16.msra.mxu1 %v1777_v49  ;;  %v741_v49 = vld [vmem:[%s2840_s3 + $0x1f0] sm:$0xff]  ;;  %v1797_v16 = vpack.c.bf16 %v726_v9, %v725_v7  ;;  %vm562_vm2 = vcmp.eq.s32.totalorder %v560_v13, 0  ;;  %vm565_vm3 = vcmp.eq.s32.totalorder %v560_v13, 2  ;;  %vm561_vm4 = vcmp.lt.s32.totalorder %v560_v13, 2  ;;  %v763_v7 = vld [vmem:[%s2840_s3 + $0x2a0] sm:$0xff]  ;;  %v764_v9 = vld [vmem:[%s2840_s3 + $0x2a8] sm:$0xff] }
  0xeb   :  { %1738 = vmatpush3.bf16.msra.mxu0 %v1737_v44  ;;  %1780 = vmatprep.subr.bf16.mxu1 %v1779_v60  ;;  %v688_v44 = vld [vmem:[%s2840_s3 + $0x48] sm:$0xff]  ;;  %v689_v60 = vld [vmem:[%s2840_s3 + $0x50] sm:$0xff]  ;;  %v1795_v4 = vpack.c.bf16 %v742_v50, %v741_v49  ;;  %v567_v19 = vsel %vm565_vm3, %v256_v54, %v2344_v52  ;;  %v1807_v59 = vpack.c.bf16 %v764_v9, %v763_v7  ;;  %v767_v45 = vld [vmem:[%s2840_s3 + $0x2c0] sm:$0xff]  ;;  %v466_v9 = vsel %vm144_vm1, nan, %v2436_v14 }
  0xec   :  { %1740 = vmatprep.subr.bf16.mxu0 %v1739_v10  ;;  %1027 = vmatprep.mubr.f32.mxu0 %v674_v17  ;;  %v1753_v56 = vpack.c.bf16 %v688_v44, %v687_v41  ;;  %v1190_v10 = vld [vmem:[%s2843_s5 + $0x88] sm:$0xff]  ;;  %v1757_v12 = vpack.c.bf16 %v690_v20, %v689_v60  ;;  %v1173_v17 = vld [vmem:[%s2843_s5] sm:$0xff]  ;;  %v675_v52 = vld [vmem:[%s2842_s1 + $0x10] sm:$0xff] }
  0xed   :  { %v1831_v46 = vpack.c.bf16 %v1190_v10, %v1189_v22  ;;  %v744_v41 = vld [vmem:[%s2840_s3 + $0x208] sm:$0xff]  ;;  %v673_v44 = vld [vmem:[%s2842_s1] sm:$0xff]  ;;  %v1179_v60 = vld [vmem:[%s2843_s5 + $0x30] sm:$0xff] }
  0xee   :  { %1782 = vmatpush3.bf16.msra.mxu1 %v1781_v53  ;;  %v1174_v53 = vld [vmem:[%s2843_s5 + $0x8] sm:$0xff]  ;;  %v1801_v50 = vpack.c.bf16 %v744_v41, %v743_v38  ;;  %v1197_v20 = vld [vmem:[%s2843_s5 + $0xc0] sm:$0xff]  ;;  %v770_v38 = vld [vmem:[%s2840_s3 + $0x2d8] sm:$0xff] }
  0xef   :  { %1742 = vmatpush3.bf16.msra.mxu0 %v1741_v18  ;;  %1784 = vmatprep.subr.bf16.mxu1 %v1783_v21  ;;  %v564_v18 = vsel %vm562_vm2, %v2342_v47, %v253_v37  ;;  %v1759_v21 = vpack.c.bf16 %v708_v63, %v707_v11  ;;  %v709_v37 = vld [vmem:[%s2840_s3 + $0xf0] sm:$0xff]  ;;  %v710_v47 = vld [vmem:[%s2840_s3 + $0xf8] sm:$0xff]  ;;  %v1833_v54 = vpack.c.bf16 %v1174_v53, %v1173_v17  ;;  %v747_v11 = vld [vmem:[%s2840_s3 + $0x220] sm:$0xff] }
  0xf0   :  { %1744 = vmatprep.subr.bf16.mxu0 %v1743_v25  ;;  %v1192_v25 = vld [vmem:[%s2843_s5 + $0x98] sm:$0xff]  ;;  %v568_v61 = vsel %vm561_vm4, %v564_v18, %v567_v19  ;;  %v1199_v17 = vld [vmem:[%s2843_s5 + $0xd0] sm:$0xff] }
  0xf1   :  { %v1835_v48 = vpack.c.bf16 %v1192_v25, %v1191_v24  ;;  %v569_v36 = vsel %vm248_vm14, nan, %v568_v61  ;;  %v1200_v53 = vld [vmem:[%s2843_s5 + $0xd8] sm:$0xff]  ;;  %v765_v18 = vld [vmem:[%s2840_s3 + $0x2b0] sm:$0xff]  ;;  %v1201_v61 = vld [vmem:[%s2843_s5 + $0xe0] sm:$0xff] }
  0xf2   :  { %1786 = vmatpush3.bf16.msra.mxu1 %v1785_v28  ;;  %v1176_v28 = vld [vmem:[%s2843_s5 + $0x18] sm:$0xff]  ;;  %v749_v24 = vld [vmem:[%s2840_s3 + $0x230] sm:$0xff]  ;;  %v1851_v25 = vpack.c.bf16 %v1200_v53, %v1199_v17 }
  0xf3   :  { %1746 = vmatpush3.bf16.msra.mxu0 %v1745_v58  ;;  %1788 = vmatprep.subr.bf16.mxu1 %v1787_v5  ;;  %v1763_v58 = vpack.c.bf16 %v710_v47, %v709_v37  ;;  %v1193_v5 = vld [vmem:[%s2843_s5 + $0xa0] sm:$0xff]  ;;  %v1837_v35 = vpack.c.bf16 %v1176_v28, %v1175_v27  ;;  %v766_v19 = vld [vmem:[%s2840_s3 + $0x2b8] sm:$0xff]  ;;  %v1183_v37 = vld [vmem:[%s2843_s5 + $0x50] sm:$0xff] }
  0xf4   :  { %1748 = vmatprep.subr.bf16.mxu0 %v1747_v1  ;;  %v760_v1 = vld [vmem:[%s2840_s3 + $0x288] sm:$0xff]  ;;  %v1839_v39 = vpack.c.bf16 %v1194_v32, %v1193_v5  ;;  %v1184_v47 = vld [vmem:[%s2843_s5 + $0x58] sm:$0xff]  ;;  %v1185_v5 = vld [vmem:[%s2843_s5 + $0x60] sm:$0xff] }
  0xf5   :  { %v1853_v27 = vpack.c.bf16 %v1184_v47, %v1183_v37  ;;  %v1186_v32 = vld [vmem:[%s2843_s5 + $0x68] sm:$0xff]  ;;  %v1188_v41 = vld [vmem:[%s2843_s5 + $0x78] sm:$0xff]  ;;  %v1211_v17 = vld [vmem:[%s2843_s5 + $0x130] sm:$0xff] }
  0xf6   :  { %1790 = vmatpush3.bf16.msra.mxu1 %v1789_v33  ;;  %v1177_v33 = vld [vmem:[%s2843_s5 + $0x20] sm:$0xff]  ;;  %v758_v7 = vld [vmem:[%s2840_s3 + $0x278] sm:$0xff]  ;;  %v1218_v47 = vld [vmem:[%s2843_s5 + $0x168] sm:$0xff] }
  0xf7   :  { %1750 = vmatpush3.bf16.msra.mxu0 %v1749_v40  ;;  %1792 = vmatprep.subr.bf16.mxu1 %v1791_v42  ;;  %v1799_v40 = vpack.c.bf16 %v760_v1, %v759_v55  ;;  %v1195_v42 = vld [vmem:[%s2843_s5 + $0xb0] sm:$0xff]  ;;  %v1841_v49 = vpack.c.bf16 %v1178_v31, %v1177_v33  ;;  %v752_v1 = vld [vmem:[%s2840_s3 + $0x248] sm:$0xff]  ;;  %v1208_v14 = vld [vmem:[%s2843_s5 + $0x118] sm:$0xff] }
  0xf8   :  { %1752 = vmatprep.subr.bf16.mxu0 %v1751_v43  ;;  %v762_v43 = vld [vmem:[%s2840_s3 + $0x298] sm:$0xff]  ;;  %v1843_v57 = vpack.c.bf16 %v1196_v8, %v1195_v42  ;;  %v753_v8 = vld [vmem:[%s2840_s3 + $0x250] sm:$0xff]  ;;  %v1217_v37 = vld [vmem:[%s2843_s5 + $0x160] sm:$0xff] }
  0xf9   :  { %v1803_v13 = vpack.c.bf16 %v762_v43, %v761_v3  ;;  %v754_v3 = vld [vmem:[%s2840_s3 + $0x258] sm:$0xff]  ;;  %v771_v43 = vld [vmem:[%s2840_s3 + $0x2e0] sm:$0xff] }
  0xfa   :  { %1794 = vmatpush3.bf16.msra.mxu1 %v1793_v62  ;;  %v1180_v62 = vld [vmem:[%s2843_s5 + $0x38] sm:$0xff] }
  0xfb   :  { %1754 = vmatpush3.bf16.msra.mxu0 %v1753_v56  ;;  %1796 = vmatprep.subr.bf16.mxu1 %v1795_v4  ;;  %v746_v56 = vld [vmem:[%s2840_s3 + $0x218] sm:$0xff]  ;;  %v1198_v4 = vld [vmem:[%s2843_s5 + $0xc8] sm:$0xff]  ;;  %v1845_v22 = vpack.c.bf16 %v1180_v62, %v1179_v60  ;;  %v773_v62 = vld [vmem:[%s2840_s3 + $0x2f0] sm:$0xff] }
  0xfc   :  { %1756 = vmatprep.subr.bf16.mxu0 %v1755_v15  ;;  %v678_v15 = vld [vmem:[%s2842_s1 + $0x28] sm:$0xff]  ;;  %v1805_v10 = vpack.c.bf16 %v746_v56, %v745_v51  ;;  %v1847_v63 = vpack.c.bf16 %v1198_v4, %v1197_v20  ;;  %v757_v4 = vld [vmem:[%s2840_s3 + $0x270] sm:$0xff] }
  0xfd   :  { %v756_v60 = vld [vmem:[%s2840_s3 + $0x268] sm:$0xff] }
  0xfe   :  { %1798 = vmatpush3.bf16.msra.mxu1 %v1797_v16  ;;  %v1182_v16 = vld [vmem:[%s2843_s5 + $0x48] sm:$0xff] }
  0xff   :  { %1758 = vmatpush3.bf16.msra.mxu0 %v1757_v12  ;;  %1832 = vmatprep.subr.bf16.mxu1 %v1831_v46  ;;  %v1181_v12 = vld [vmem:[%s2843_s5 + $0x40] sm:$0xff]  ;;  %v748_v46 = vld [vmem:[%s2840_s3 + $0x228] sm:$0xff] }
 0x100   :  { %1760 = vmatprep.subr.bf16.mxu0 %v1759_v21  ;;  %v1849_v21 = vpack.c.bf16 %v1182_v16, %v1181_v12  ;;  %v1809_v23 = vpack.c.bf16 %v748_v46, %v747_v11  ;;  %v677_v11 = vld [vmem:[%s2842_s1 + $0x20] sm:$0xff]  ;;  %v1867_v12 = vpack.c.bf16 %v1208_v14, %v1207_v30 }
 0x101   :  { %1098 = vmatmul.mubr.f32.vlgmr.msra.gmra.mrb[2].mxu1 %v675_v52  ;;  %v1811_v52 = vpack.c.bf16 %v766_v19, %v765_v18  ;;  %v1209_v16 = vld [vmem:[%s2843_s5 + $0x120] sm:$0xff]  ;;  %v1214_v19 = vld [vmem:[%s2843_s5 + $0x148] sm:$0xff] }
 0x102   :  { %1834 = vmatpush3.bf16.msra.mxu1 %v1833_v54  ;;  %1285 = vmatprep.mubr.f32.mxu1 %v569_v36  ;;  %v750_v54 = vld [vmem:[%s2840_s3 + $0x238] sm:$0xff]  ;;  %v1203_v36 = vld [vmem:[%s2843_s5 + $0xf0] sm:$0xff]  ;;  %v1213_v18 = vld [vmem:[%s2843_s5 + $0x140] sm:$0xff] }
 0x103   :  { %1762 = vmatpush3.bf16.msra.mxu0 %v1761_v26  ;;  %1836 = vmatprep.subr.bf16.mxu1 %v1835_v48  ;;  %v1202_v26 = vld [vmem:[%s2843_s5 + $0xe8] sm:$0xff]  ;;  %v1813_v28 = vpack.c.bf16 %v750_v54, %v749_v24  ;;  %v1216_v24 = vld [vmem:[%s2843_s5 + $0x158] sm:$0xff]  ;;  %v1219_v54 = vld [vmem:[%s2843_s5 + $0x170] sm:$0xff] }
 0x104   :  { %1764 = vmatprep.subr.bf16.mxu0 %v1763_v58  ;;  %v768_v48 = vld [vmem:[%s2840_s3 + $0x2c8] sm:$0xff]  ;;  %v751_v58 = vld [vmem:[%s2840_s3 + $0x240] sm:$0xff]  ;;  %v1855_v0 = vpack.c.bf16 %v1202_v26, %v1201_v61  ;;  %v1220_v61 = vld [vmem:[%s2843_s5 + $0x178] sm:$0xff] }
 0x105   :  { %v1815_v55 = vpack.c.bf16 %v768_v48, %v767_v45  ;;  %v1817_v33 = vpack.c.bf16 %v752_v1, %v751_v58  ;;  %v1885_v26 = vpack.c.bf16 %v1220_v61, %v1219_v54 }
 0x106   :  { %1838 = vmatpush3.bf16.msra.mxu1 %v1837_v35  ;;  %v1204_v35 = vld [vmem:[%s2843_s5 + $0xf8] sm:$0xff] }
 0x107   :  { %1766 = vmatpush3.bf16.msra.mxu0 %v1765_v29  ;;  %1840 = vmatprep.subr.bf16.mxu1 %v1839_v39  ;;  %v769_v29 = vld [vmem:[%s2840_s3 + $0x2d0] sm:$0xff]  ;;  %v1857_v39 = vpack.c.bf16 %v1186_v32, %v1185_v5  ;;  %v1859_v31 = vpack.c.bf16 %v1204_v35, %v1203_v36 }
 0x108   :  { %1800 = vmatprep.subr.bf16.mxu0 %v1799_v40  ;;  %v1187_v40 = vld [vmem:[%s2843_s5 + $0x70] sm:$0xff]  ;;  %v1819_v42 = vpack.c.bf16 %v770_v38, %v769_v29 }
 0x10a   :  { %1028 = vmatmul.mubr.f32.vlgmr.msra.gmra.mrb[2].mxu0 %v673_v44  ;;  %1842 = vmatpush3.bf16.msra.mxu1 %v1841_v49  ;;  %v772_v44 = vld [vmem:[%s2840_s3 + $0x2e8] sm:$0xff]  ;;  %v1861_v49 = vpack.c.bf16 %v1188_v41, %v1187_v40 }
 0x10b   :  { %1802 = vmatpush3.bf16.msra.mxu0 %v1801_v50  ;;  %1844 = vmatprep.subr.bf16.mxu1 %v1843_v57  ;;  %v1821_v50 = vpack.c.bf16 %v754_v3, %v753_v8  ;;  %v1823_v51 = vpack.c.bf16 %v772_v44, %v771_v43  ;;  %v755_v57 = vld [vmem:[%s2840_s3 + $0x260] sm:$0xff] }
 0x10c   :  { %1804 = vmatprep.subr.bf16.mxu0 %v1803_v13  ;;  %1167 = vmatprep.mubr.f32.mxu0 %v678_v15  ;;  %v774_v13 = vld [vmem:[%s2840_s3 + $0x2f8] sm:$0xff]  ;;  %v1825_v56 = vpack.c.bf16 %v756_v60, %v755_v57  ;;  %v1829_v15 = vpack.c.bf16 %v758_v7, %v757_v4  ;;  %v1399_v43 = vld [vmem:[%s2844_s6] ss:$0 sm:$0xff] }
 0x10d   :  { %v1827_v20 = vpack.c.bf16 %v774_v13, %v773_v62 }
 0x10e   :  { %1846 = vmatpush3.bf16.msra.mxu1 %v1845_v22  ;;  %v1205_v22 = vld [vmem:[%s2843_s5 + $0x100] sm:$0xff] }
 0x10f   :  { %1806 = vmatpush3.bf16.msra.mxu0 %v1805_v10  ;;  %1848 = vmatprep.subr.bf16.mxu1 %v1847_v63  ;;  %v1206_v10 = vld [vmem:[%s2843_s5 + $0x108] sm:$0xff] }
 0x110   :  { %1808 = vmatprep.subr.bf16.mxu0 %v1807_v59  ;;  %v1864_v63 = vpack.c.bf16 %v1206_v10, %v1205_v22  ;;  %v1210_v59 = vld [vmem:[%s2843_s5 + $0x128] sm:$0xff] }
 0x111   :  { %v1870_v46 = vpack.c.bf16 %v1210_v59, %v1209_v16 }
 0x112   :  { %1850 = vmatpush3.bf16.msra.mxu1 %v1849_v21  ;;  %v1876_v21 = vpack.c.bf16 %v1214_v19, %v1213_v18 }
 0x113   :  { %1810 = vmatpush3.bf16.msra.mxu0 %v1809_v23  ;;  %1852 = vmatprep.subr.bf16.mxu1 %v1851_v25  ;;  %v1215_v23 = vld [vmem:[%s2843_s5 + $0x150] sm:$0xff] }
 0x114   :  { %1812 = vmatprep.subr.bf16.mxu0 %v1811_v52  ;;  %v1879_v25 = vpack.c.bf16 %v1216_v24, %v1215_v23  ;;  %v1882_v52 = vpack.c.bf16 %v1218_v47, %v1217_v37 }
 0x116   :  { %1854 = vmatpush3.bf16.msra.mxu1 %v1853_v27 }
 0x117   :  { %1814 = vmatpush3.bf16.msra.mxu0 %v1813_v28  ;;  %1856 = vmatprep.subr.bf16.mxu1 %v1855_v0 }
 0x118   :  { %1816 = vmatprep.subr.bf16.mxu0 %v1815_v55 }
 0x11a   :  { %1858 = vmatpush3.bf16.msra.mxu1 %v1857_v39 }
 0x11b   :  { %1818 = vmatpush3.bf16.msra.mxu0 %v1817_v33  ;;  %1860 = vmatprep.subr.bf16.mxu1 %v1859_v31 }
 0x11c   :  { %1820 = vmatprep.subr.bf16.mxu0 %v1819_v42 }
 0x11e   :  { %1862 = vmatpush3.bf16.msra.mxu1 %v1861_v49 }
 0x11f   :  { %1822 = vmatpush3.bf16.msra.mxu0 %v1821_v50 }
 0x120   :  { %1824 = vmatprep.subr.bf16.mxu0 %v1823_v51 }
 0x121   :  { %1286 = vmatmul.mubr.f32.vlgmr.msra.gmra.mrb[4].mxu1 %v466_v9 }
 0x123   :  { %1826 = vmatpush3.bf16.msra.mxu0 %v1825_v56 }
 0x124   :  { %1828 = vmatprep.subr.bf16.mxu0 %v1827_v20 }
 0x127   :  { %1830 = vmatpush3.bf16.msra.mxu0 %v1829_v15 }
 0x128   :  { %1863 = vmatprep.subr.bf16.mxu0 %v1923_v2 }
 0x12a   :  { %1168 = vmatmul.mubr.f32.vlgmr.msra.gmra.mrb[4].mxu0 %v677_v11 }
 0x12b   :  { %1865 = vmatpush3.bf16.msra.mxu0 %v1864_v63  ;;  %1676 = vmatprep.mubr.msk.f32.mxu0 %vm1924_vm0, %v1925_v6  ;;  %v1212_v6 = vld [vmem:[%s2843_s5 + $0x138] sm:$0xff] }
 0x12c   :  { %1866 = vmatprep.subr.bf16.mxu0 %v1923_v2  ;;  %v1873_v53 = vpack.c.bf16 %v1212_v6, %v1211_v17 }
 0x12f   :  { %1868 = vmatpush3.bf16.msra.mxu0 %v1867_v12 }
 0x130   :  { %1869 = vmatprep.subr.bf16.mxu0 %v1923_v2 }
 0x133   :  { %1871 = vmatpush3.bf16.msra.mxu0 %v1870_v46 }
 0x134   :  { %1872 = vmatprep.subr.bf16.mxu0 %v1923_v2 }
 0x137   :  { %1874 = vmatpush3.bf16.msra.mxu0 %v1873_v53 }
 0x138   :  { %1875 = vmatprep.subr.bf16.mxu0 %v1923_v2 }
 0x13b   :  { %1877 = vmatpush3.bf16.msra.mxu0 %v1876_v21 }
 0x13c   :  { %1878 = vmatprep.subr.bf16.mxu0 %v1923_v2 }
 0x13f   :  { %1880 = vmatpush3.bf16.msra.mxu0 %v1879_v25 }
 0x140   :  { %1881 = vmatprep.subr.bf16.mxu0 %v1923_v2 }
 0x143   :  { %1883 = vmatpush3.bf16.msra.mxu0 %v1882_v52 }
 0x144   :  { %1884 = vmatprep.subr.bf16.mxu0 %v1923_v2 }
 0x147   :  { %1886 = vmatpush3.bf16.msra.mxu0 %v1885_v26 }
 0x14a   :  { %1677 = vmatmul.mubr.f32.vlgmr.msra.gmra.mrb[6].mxu0 %v2394_v34 }
 0x1b4   :  { %v959_v45 = vpop.f32.mrb[0].mxu1 }
 0x1b5   :  { %v1643_v48 = vpop.f32.mrb[1].mxu1 }
 0x1bd   :  { %v1432_v27 = vpop.f32.mrb[0].mxu0 }
 0x1be   :  { %v1433_v28 = vpop.f32.mrb[1].mxu0 }
 0x1bf   :  { %v1434_v58 = vadd.f32 %v1433_v28, %v1432_v27 }
 0x1c1   :  { %v960_v0 = vadd.f32 %v1434_v58, %v959_v45 }
 0x1d4   :  { %v1519_v5 = vpop.f32.mrb[2].mxu1 }
 0x1d5   :  { %v1520_v32 = vpop.f32.mrb[3].mxu1 }
 0x1d6   :  { %v1521_v55 = vadd.f32 %v1520_v32, %v1519_v5 }
 0x1dd   :  { %v1484_v1 = vpop.f32.mrb[2].mxu0 }
 0x1de   :  { %v1485_v36 = vpop.f32.mrb[3].mxu0 }
 0x1df   :  { %v1486_v35 = vadd.f32 %v1485_v36, %v1484_v1 }
 0x1e1   :  { %v1030_v29 = vadd.f32 %v1486_v35, %v960_v0 }
 0x1e3   :  { %v1100_v38 = vadd.f32 %v1521_v55, %v1030_v29 }
 0x1f4   :  { %v1589_v39 = vpop.f32.mrb[4].mxu1 }
 0x1f5   :  { %v1590_v33 = vpop.f32.mrb[5].mxu1 }
 0x1f6   :  { %v1591_v2 = vadd.f32 %v1590_v33, %v1589_v39 }
 0x1fd   :  { %v1554_v31 = vpop.f32.mrb[4].mxu0 }
 0x1fe   :  { %v1555_v40 = vpop.f32.mrb[5].mxu0 }
 0x1ff   :  { %v1556_v34 = vadd.f32 %v1555_v40, %v1554_v31 }
 0x201   :  { %v1170_v41 = vadd.f32 %v1556_v34, %v1100_v38 }
 0x21d   :  { %v1357_v42 = vpop.f32.mrb[6].mxu0 }
 0x21e   :  { %v1358_v8 = vadd.f32 %v1591_v2, %v1357_v42  ;;  %v1678_v3 = vpop.f32.mrb[7].mxu0 }
 0x220   :  { %v1361_v44 = vadd.f32 %v1358_v8, %v1170_v41 }
 0x222   :  { %v1369_v49 = vadd.f32 %v1399_v43, %v1361_v44 }
 0x224   :  { %1370 = vst [vmem:[%s2845_s7] sm:$0xff] %v1369_v49 }

</bundles_post_ra>
